<compile_context>
chip_gen: v6e
topology: v6e:2x2x1
jax: 0.10.0
libtpu: 0.0.40
codegen_flags: <defaults>
</compile_context>

<pallas_src>
import jax
import jax.numpy as jnp
from jax.experimental import pallas as pl
from jax.experimental.pallas import tpu as pltpu

# Module hyper-params (from torch.nn.Conv2d(8, 4, 1, groups=4))
C_IN = 8
C_OUT = 4
GROUPS = 4
CIN_PER_G = C_IN // GROUPS    # 2
COUT_PER_G = C_OUT // GROUPS  # 1


def _grouped_1x1_conv_kernel(x_ref, p_ref, o_ref):
    # x_ref: VMEM (R, 2*HW)  row r = n*GROUPS + g holds [chan 2g | chan 2g+1]
    # p_ref: VMEM (R, 3)     per-row columns [w0, w1, bias]
    # o_ref: VMEM (R, HW)
    hw = o_ref.shape[1]
    xe = x_ref[:, :hw]        # static lane slices; pure vreg selection when
    xo = x_ref[:, hw:]        # HW is a multiple of 128 (256 here)
    w0 = p_ref[:, 0:1]
    w1 = p_ref[:, 1:2]
    b = p_ref[:, 2:3]
    o_ref[...] = w0 * xe + w1 * xo + b


def pack_params(weight, bias, n):
    """Build the (N*C_OUT, 3) [w0|w1|bias] slab ONCE (static per module+batch).

    weight: (4, 2, 1, 1) f32, bias: (4,) f32.  Row r = n*C_OUT + oc.
    """
    w = weight.reshape(C_OUT, CIN_PER_G).astype(jnp.float32)   # (4, 2)
    r = n * C_OUT
    w0 = jnp.tile(w[:, 0], n).reshape(r, 1)
    w1 = jnp.tile(w[:, 1], n).reshape(r, 1)
    b = jnp.tile(bias.astype(jnp.float32), n).reshape(r, 1)
    return jnp.concatenate([w0, w1, b], axis=1)                # (r, 3)


@jax.jit
def grouped_conv2d_1x1(x_nchw, packed_params):
    """x_nchw: (N, 8, H, W) f32; packed_params: (N*4, 3) f32 from pack_params."""
    N, C, H, W = x_nchw.shape
    assert C == C_IN
    HW = H * W
    R = N * GROUPS  # == N * C_OUT (cout_per_group == 1)

    # Pure contiguous reshape: NCHW layout already places channels 2g and 2g+1
    # of image n side-by-side, so row r = n*GROUPS + g is [x[n,2g] | x[n,2g+1]].
    x_slab = x_nchw.astype(jnp.float32).reshape(R, CIN_PER_G * HW)

    vmem = pl.BlockSpec(memory_space=pltpu.MemorySpace.VMEM)
    out_flat = pl.pallas_call(
        _grouped_1x1_conv_kernel,
        out_shape=jax.ShapeDtypeStruct((R, HW), jnp.float32),
        in_specs=[vmem, vmem],
        out_specs=vmem,
        cost_estimate=pl.CostEstimate(
            flops=4 * R * HW,                                # 2 FMA + add per elem
            transcendentals=0,
            bytes_accessed=(2 * R * HW + R * HW + 3 * R) * 4,
        ),
    )(x_slab, packed_params)

    # Output rows are (n, oc) in order -> direct reshape back to NCHW.
    return out_flat.reshape(N, C_OUT, H, W)


if __name__ == "__main__":
    key = jax.random.PRNGKey(0)
    kx, kw, kb = jax.random.split(key, 3)

    # Small NCHW input consistent with Conv2d(8, 4, 1, groups=4)
    N, H, W = 2, 16, 16
    x = jax.random.normal(kx, (N, C_IN, H, W), dtype=jnp.float32)

    # Deterministic parameter init (torch default: uniform(-k, k), k=1/sqrt(fan_in))
    fan_in = CIN_PER_G * 1 * 1
    bound = 1.0 / (fan_in ** 0.5)
    weight = jax.random.uniform(kw, (C_OUT, CIN_PER_G, 1, 1),
                                minval=-bound, maxval=bound, dtype=jnp.float32)
    bias = jax.random.uniform(kb, (C_OUT,),
                              minval=-bound, maxval=bound, dtype=jnp.float32)

    # Parameter packing hoisted out of the per-forward path (done once).
    packed = jax.block_until_ready(pack_params(weight, bias, N))

    out = grouped_conv2d_1x1(x, packed)
    out = jax.block_until_ready(out)

    # Reference: XLA grouped convolution (NCHW / OIHW)
    ref = jax.lax.conv_general_dilated(
        x, weight, window_strides=(1, 1), padding="VALID",
        dimension_numbers=("NCHW", "OIHW", "NCHW"),
        feature_group_count=GROUPS,
    ) + bias.reshape(1, C_OUT, 1, 1)

    assert out.shape == (N, C_OUT, H, W)
    assert jnp.allclose(out, ref, atol=1e-5, rtol=1e-5)
    print("KERNEL_OK")
</pallas_src>

<mosaic_0001>
module attributes {stable_mosaic.version = 11 : i64} {
  func.func @_grouped_1x1_conv_kernel(%arg0: memref<8x512xf32, #tpu.memory_space<vmem>>, %arg1: memref<8x3xf32, #tpu.memory_space<vmem>>, %arg2: memref<8x256xf32, #tpu.memory_space<vmem>>) attributes {dimension_semantics = [], scalar_prefetch = 0 : i64, scratch_operands = 0 : i64, tpu.core_type = #tpu.core_type<tc>} {
    %c0 = arith.constant 0 : index
    %c0_0 = arith.constant 0 : index
    %0 = vector.load %arg0[%c0, %c0_0] : memref<8x512xf32, #tpu.memory_space<vmem>>, vector<8x256xf32>
    %c0_1 = arith.constant 0 : index
    %c256 = arith.constant 256 : index
    %1 = vector.load %arg0[%c0_1, %c256] : memref<8x512xf32, #tpu.memory_space<vmem>>, vector<8x256xf32>
    %c0_2 = arith.constant 0 : index
    %c0_3 = arith.constant 0 : index
    %2 = vector.load %arg1[%c0_2, %c0_3] : memref<8x3xf32, #tpu.memory_space<vmem>>, vector<8x1xf32>
    %c0_4 = arith.constant 0 : index
    %c1 = arith.constant 1 : index
    %3 = vector.load %arg1[%c0_4, %c1] : memref<8x3xf32, #tpu.memory_space<vmem>>, vector<8x1xf32>
    %c0_5 = arith.constant 0 : index
    %c2 = arith.constant 2 : index
    %4 = vector.load %arg1[%c0_5, %c2] : memref<8x3xf32, #tpu.memory_space<vmem>>, vector<8x1xf32>
    %5 = vector.broadcast %2 : vector<8x1xf32> to vector<8x256xf32>
    %6 = arith.mulf %5, %0 : vector<8x256xf32>
    %7 = vector.broadcast %3 : vector<8x1xf32> to vector<8x256xf32>
    %8 = arith.mulf %7, %1 : vector<8x256xf32>
    %9 = arith.addf %6, %8 : vector<8x256xf32>
    %10 = vector.broadcast %4 : vector<8x1xf32> to vector<8x256xf32>
    %11 = arith.addf %9, %10 : vector<8x256xf32>
    %c0_6 = arith.constant 0 : index
    %c0_7 = arith.constant 0 : index
    %12 = vector.load %arg2[%c0_6, %c0_7] : memref<8x256xf32, #tpu.memory_space<vmem>>, vector<8x256xf32>
    tpu.vector_store %arg2[%c0_6, %c0_7], %11 {strides = array<i32>} : memref<8x256xf32, #tpu.memory_space<vmem>>, vector<8x256xf32>,
    return
  }
}

</mosaic_0001>

<bundles_post_ra>
// kernel: grouped_conv2d_1x1.1
= control target key start
LH: loop header
LB: loop body
LE: loop exit
PB: predicated region body
PF: predicated region fallthrough
CT: control target
= control target key end

     0   :  { %v50_v0 = vmov 0   ;;  %v51_v2 = vmov 2   ;;  %v52_v3 = vmov 1   ;;  %s89_s1 = inlined_call_operand.vmem [shape: f32[8,3], index: 1, kind: input, shape index: {}]   ;;  %s90_s0 = inlined_call_operand.vmem [shape: f32[8,512], index: 0, kind: input, shape index: {}]   ;;  %s91_s2 = inlined_call_operand.vmem [shape: f32[8,256], index: 2, kind: output, shape index: {}]  }
   0x1   :  { %46 = vset.pattern.permute.xlu0 %v50_v0  ;;  %v15_v1 = vld [vmem:[%s89_s1] sm:$0xff]  ;;  %48 = vset.pattern.permute.xlu1 %v51_v2  ;;  %v12_v6 = vld [vmem:[%s90_s0 + $0x8] sm:$0xff]  ;;  %v13_v7 = vld [vmem:[%s90_s0 + $0x10] sm:$0xff] }
   0x2   :  { %18 = vperm.xlu0 %46, %v15_v1   ;;  %32 = vperm.xlu1 %48, %v15_v1   ;;  %v11_v5 = vld [vmem:[%s90_s0] sm:$0xff]  ;;  %v14_v8 = vld [vmem:[%s90_s0 + $0x18] sm:$0xff] }
   0x6   :  { %47 = vset.pattern.permute.xlu0 %v52_v3 }
   0x7   :  { %24 = vperm.xlu0 %47, %v15_v1  }
   0xb   :  { %49 = vset.pattern.permute.xlu0 %v51_v2 }
  0x7d   :  { %v19_v4 = vpop.permute.xlu0 %18  ;;  %v33_v14 = vpop.permute.xlu1 %32 }
  0x7e   :  { %v21_v10 = vmul.f32 %v19_v4, %v11_v5  ;;  %v22_v11 = vmul.f32 %v19_v4, %v12_v6 }
  0x82   :  { %v25_v9 = vpop.permute.xlu0 %24 }
  0x83   :  { %v27_v12 = vmul.f32 %v25_v9, %v13_v7  ;;  %v28_v13 = vmul.f32 %v25_v9, %v14_v8 }
  0x85   :  { %v29_v15 = vadd.f32 %v27_v12, %v21_v10  ;;  %v30_v16 = vadd.f32 %v28_v13, %v22_v11 }
  0x87   :  { %v35_v17 = vadd.f32 %v33_v14, %v29_v15  ;;  %v36_v18 = vadd.f32 %v33_v14, %v30_v16 }
  0x89   :  { %37 = vst [vmem:[%s91_s2] sm:$0xff] %v35_v17  ;;  %38 = vst [vmem:[%s91_s2 + $0x8] sm:$0xff] %v36_v18 }

</bundles_post_ra>
